<compile_context>
chip_gen: v6e
topology: v6e:2x2x1
jax: 0.10.0
libtpu: 0.0.40
codegen_flags: <defaults>
</compile_context>

<pallas_src>
import functools

import jax
import jax.numpy as jnp
from jax.experimental import pallas as pl
from jax.experimental.pallas import tpu as pltpu


def _avgpool_kernel(x_ref, o_ref, acc_ref, *, inv_n):
    # x_ref : (tile_r, tile_s) input tile in VMEM
    # o_ref : (tile_r, 1) output tile
    # acc_ref: (tile_r, 1) f32 accumulator (persists across the spatial axis)
    @pl.when(pl.program_id(1) == 0)
    def _():
        acc_ref[...] = jnp.zeros_like(acc_ref)

    # Widen to f32 inside the reduction (no full f32 tile materialized).
    acc_ref[...] += jnp.sum(x_ref[...], axis=-1, keepdims=True,
                            dtype=jnp.float32)
    # Cheap (tile_r x 1) scale+store every step; hidden under the input DMA.
    o_ref[...] = (acc_ref[...] * jnp.float32(inv_n)).astype(o_ref.dtype)


def _sublane_multiple(dtype) -> int:
    itemsize = jnp.dtype(dtype).itemsize
    # 8 for 4-byte, 16 for 2-byte, 32 for 1-byte dtypes.
    return max(8, 32 // max(1, itemsize))


def _choose_tile_rows(rows: int, tile_s: int, dtype, max_tile_rows: int) -> int:
    itemsize = jnp.dtype(dtype).itemsize
    sublane = _sublane_multiple(dtype)
    # Target ~4 MiB per input tile: double-buffered it stays well inside the
    # default scoped VMEM limits on all generations.
    target_bytes = 4 * 1024 * 1024
    tile_r = target_bytes // max(1, tile_s * itemsize)
    tile_r = max(sublane, (tile_r // sublane) * sublane)   # sublane multiple
    cap = max(sublane, (max_tile_rows // sublane) * sublane)
    tile_r = min(tile_r, cap)
    # Never bigger than the (sublane-padded) row count.
    rows_padded_min = ((rows + sublane - 1) // sublane) * sublane
    tile_r = min(tile_r, rows_padded_min)
    return max(sublane, tile_r)


def adaptive_avg_pool2d_1x1(x, *, max_tile_rows: int = 2048,
                            max_tile_spatial: int = 32768):
    """x: (N, C, H, W) -> (N, C, 1, 1); same as torch.nn.AdaptiveAvgPool2d((1,1))."""
    N, C, H, W = x.shape
    rows = N * C
    spatial = H * W
    x2d = x.reshape(rows, spatial)

    # ---- spatial tiling (only kicks in for very large H*W) -----------------
    max_tile_spatial = max(128, (max_tile_spatial // 128) * 128)
    if spatial <= max_tile_spatial:
        tile_s = spatial                      # single full-width block (exact)
        num_s = 1
        spatial_padded = spatial
    else:
        tile_s = max_tile_spatial             # multiple of 128 lanes
        num_s = pl.cdiv(spatial, tile_s)
        spatial_padded = num_s * tile_s
        # Zero columns add 0 to the running sum -> mean still exact.
        x2d = jnp.pad(x2d, ((0, 0), (0, spatial_padded - spatial)))

    # ---- row tiling ---------------------------------------------------------
    tile_r = _choose_tile_rows(rows, tile_s, x.dtype, max_tile_rows)
    num_r = pl.cdiv(rows, tile_r)
    rows_padded = num_r * tile_r
    if rows_padded != rows:
        # Zero-pad tail rows; padded outputs are sliced off below.
        x2d = jnp.pad(x2d, ((0, rows_padded - rows), (0, 0)))

    kernel = functools.partial(_avgpool_kernel, inv_n=1.0 / float(spatial))

    out2d = pl.pallas_call(
        kernel,
        out_shape=jax.ShapeDtypeStruct((rows_padded, 1), x.dtype),
        grid_spec=pltpu.PrefetchScalarGridSpec(
            num_scalar_prefetch=0,
            grid=(num_r, num_s),
            in_specs=[pl.BlockSpec((tile_r, tile_s), lambda i, k: (i, k))],
            out_specs=pl.BlockSpec((tile_r, 1), lambda i, k: (i, 0)),
            scratch_shapes=[pltpu.VMEM((tile_r, 1), jnp.float32)],
        ),
        compiler_params=pltpu.CompilerParams(
            # rows: independent -> megacore sharding on v7x; spatial: reduction.
            dimension_semantics=("parallel", "arbitrary"),
        ),
    )(x2d)

    return out2d[:rows].reshape(N, C, 1, 1)


if __name__ == "__main__":
    key = jax.random.PRNGKey(0)

    # 1) Primary check: small NCHW input matching the module's forward.
    x = jax.random.normal(key, (2, 4, 16, 16), dtype=jnp.float32)
    out = adaptive_avg_pool2d_1x1(x)
    jax.block_until_ready(out)
    ref = jnp.mean(x, axis=(2, 3), keepdims=True)
    assert out.shape == (2, 4, 1, 1), out.shape
    assert jnp.allclose(out, ref, atol=1e-5, rtol=1e-5)

    # 2) ResNet-style 7x7 spatial, row count not a sublane multiple, forced
    #    small row tile -> exercises multi-row-tile grid + tail-row padding.
    x2 = jax.random.normal(key, (3, 10, 7, 7), dtype=jnp.float32)   # rows=30
    out2 = adaptive_avg_pool2d_1x1(x2, max_tile_rows=8)
    jax.block_until_ready(out2)
    ref2 = jnp.mean(x2, axis=(2, 3), keepdims=True)
    assert out2.shape == (3, 10, 1, 1), out2.shape
    assert jnp.allclose(out2, ref2, atol=1e-5, rtol=1e-5)

    # 3) Forced spatial tiling (accumulator path): spatial=320 split into 128-
    #    wide blocks with zero-padding of the last block.
    x3 = jax.random.normal(key, (2, 3, 16, 20), dtype=jnp.float32)  # spatial=320
    out3 = adaptive_avg_pool2d_1x1(x3, max_tile_rows=8, max_tile_spatial=128)
    jax.block_until_ready(out3)
    ref3 = jnp.mean(x3, axis=(2, 3), keepdims=True)
    assert out3.shape == (2, 3, 1, 1), out3.shape
    assert jnp.allclose(out3, ref3, atol=1e-5, rtol=1e-5)

    # 4) bf16 input: kernel accumulates in f32; compare against f32 reference.
    x4 = jax.random.normal(key, (2, 8, 14, 14), dtype=jnp.bfloat16)
    out4 = adaptive_avg_pool2d_1x1(x4)
    jax.block_until_ready(out4)
    ref4 = jnp.mean(x4.astype(jnp.float32), axis=(2, 3),
                    keepdims=True).astype(jnp.bfloat16)
    assert out4.shape == (2, 8, 1, 1), out4.shape
    assert jnp.allclose(out4.astype(jnp.float32), ref4.astype(jnp.float32),
                        atol=1e-2, rtol=1e-2)

    print("KERNEL_OK")
</pallas_src>

<mosaic_0001>
module attributes {stable_mosaic.version = 11 : i64} {
  func.func @_avgpool_kernel(%arg0: i32, %arg1: i32, %arg2: memref<8x256xf32, #tpu.memory_space<vmem>>, %arg3: memref<8x1xf32, #tpu.memory_space<vmem>>, %arg4: memref<8x1xf32, #tpu.memory_space<vmem>>) attributes {dimension_semantics = [#tpu.dimension_semantics<parallel>, #tpu.dimension_semantics<arbitrary>], iteration_bounds = array<i64: 1, 1>, scalar_prefetch = 0 : i64, scratch_operands = 1 : i64, tpu.core_type = #tpu.core_type<tc>, window_params = [{transform_indices = @transform_0, window_bounds = array<i64: 8, 256>}, {transform_indices = @transform_1, window_bounds = array<i64: 8, 1>}]} {
    %c0_i32 = arith.constant 0 : i32
    %0 = arith.cmpi eq, %arg1, %c0_i32 : i32
    %1 = arith.extui %0 : i1 to i32
    %c0_i32_0 = arith.constant 0 : i32
    %2 = arith.cmpi ne, %1, %c0_i32_0 : i32
    scf.if %2 {
      %cst_11 = arith.constant 0.000000e+00 : f32
      %13 = vector.broadcast %cst_11 : f32 to vector<8x1xf32>
      %c0_12 = arith.constant 0 : index
      %c0_13 = arith.constant 0 : index
      %14 = vector.load %arg4[%c0_12, %c0_13] : memref<8x1xf32, #tpu.memory_space<vmem>>, vector<8x1xf32>
      tpu.vector_store %arg4[%c0_12, %c0_13], %13 {strides = array<i32>} : memref<8x1xf32, #tpu.memory_space<vmem>>, vector<8x1xf32>,
    } else {
    }
    %c0 = arith.constant 0 : index
    %c0_1 = arith.constant 0 : index
    %3 = vector.load %arg4[%c0, %c0_1] : memref<8x1xf32, #tpu.memory_space<vmem>>, vector<8x1xf32>
    %c0_2 = arith.constant 0 : index
    %c0_3 = arith.constant 0 : index
    %4 = vector.load %arg2[%c0_2, %c0_3] : memref<8x256xf32, #tpu.memory_space<vmem>>, vector<8x256xf32>
    %cst = arith.constant dense<0.000000e+00> : vector<8xf32>
    %5 = vector.multi_reduction <add>, %4, %cst [1] : vector<8x256xf32> to vector<8xf32>
    %6 = vector.shape_cast %5 : vector<8xf32> to vector<8x1xf32>
    %7 = arith.addf %3, %6 : vector<8x1xf32>
    %c0_4 = arith.constant 0 : index
    %c0_5 = arith.constant 0 : index
    %8 = vector.load %arg4[%c0_4, %c0_5] : memref<8x1xf32, #tpu.memory_space<vmem>>, vector<8x1xf32>
    tpu.vector_store %arg4[%c0_4, %c0_5], %7 {strides = array<i32>} : memref<8x1xf32, #tpu.memory_space<vmem>>, vector<8x1xf32>,
    %c0_6 = arith.constant 0 : index
    %c0_7 = arith.constant 0 : index
    %9 = vector.load %arg4[%c0_6, %c0_7] : memref<8x1xf32, #tpu.memory_space<vmem>>, vector<8x1xf32>
    %cst_8 = arith.constant 3.906250e-03 : f32
    %10 = vector.broadcast %cst_8 : f32 to vector<8x1xf32>
    %11 = arith.mulf %9, %10 : vector<8x1xf32>
    %c0_9 = arith.constant 0 : index
    %c0_10 = arith.constant 0 : index
    %12 = vector.load %arg3[%c0_9, %c0_10] : memref<8x1xf32, #tpu.memory_space<vmem>>, vector<8x1xf32>
    tpu.vector_store %arg3[%c0_9, %c0_10], %11 {strides = array<i32>} : memref<8x1xf32, #tpu.memory_space<vmem>>, vector<8x1xf32>,
    return
  }
  func.func @transform_0(%arg0: i32, %arg1: i32) -> (i32, i32) {
    %c0_i32 = arith.constant 0 : i32
    return %arg0, %arg1 : i32, i32
  }
  func.func @transform_1(%arg0: i32, %arg1: i32) -> (i32, i32) {
    %c0_i32 = arith.constant 0 : i32
    %c0_i32_0 = arith.constant 0 : i32
    return %arg0, %c0_i32 : i32, i32
  }
}

</mosaic_0001>

<bundles_post_ra>
// kernel: tpu_custom_call.1
= control target key start
LH: loop header
LB: loop body
LE: loop exit
PB: predicated region body
PF: predicated region fallthrough
CT: control target
= control target key end

     0   :  { %6 = vsyncpa [#allocation4], 0  ;;  %s67_s6 = smov [#allocation3]   ;;  %s85_s0 = inlined_call_operand.hbm [shape: f32[8,256], index: 0, kind: input, shape index: {}]   ;;  %s86_s1 = inlined_call_operand.vmem [shape: f32[8,1], index: 1, kind: output, shape index: {}]  }
   0x1   :  { %s13_s7 = sshll.u32 %s67_s6, 4  ;;  %s14_s7 = int_to_ptr.vmem [resolvable:$true] %s13_s7 }
   0x2   :  { %s53_s8 = scalar_lea.vmem %s14_s7, 256  ;;  %p58_p1 = scmp.lt.s32.totalorder %s14_s7, %s14_s7 }
   0x3   :  { %p54_p0 = scmp.ne.s32.totalorder %s14_s7, %s53_s8  ;;  %p59_p2 = scmp.lt.s32.totalorder %s53_s8, %s53_s8 }
   0x5   :  { %p60_p3 = por %p59_p2, %p58_p1 }
   0x7   :  { %p61_p4 = pnand %p60_p3, %p54_p0 }
   0x9   :  { %64 = shalt.err (!%p61_p4)
}
   0xa   :  { %16 = dma.hbm_to_vmem [thread:$0]  %s85_s0, 256, %s14_s7, [#allocation4]  }
   0xb   :  { %65 = dma.done.wait [#allocation4], 256  }
   0xc   :  { %66 = vsyncadd [#allocation4], 4294967040  ;;  %vm24_vm0 = vcmask 7168   ;;  %v68_v0 = vmov 0.0   ;;  %v27_v1 = vld [vmem:[#allocation3] sm:$0xff]  ;;  %v28_v2 = vld [vmem:[#allocation3 + $0x8] sm:$0xff] }
   0xd   :  { %25 = vst.msk [vmem:[#allocation2] sm:$0xff] %vm24_vm0, %v68_v0  ;;  %v29_v3 = vadd.f32 %v28_v2, %v27_v1 }
   0xf   :  { %30 = vadd.xlane.f32.xlu0 %v29_v3 }
  0x14   :  { %v26_v4 = vld [vmem:[#allocation2] sm:$0xff] }
  0x98   :  { %v31_v5 = vpop.xlane.xlu0 %30 }
  0x99   :  { %v32_v6 = vadd.f32 %v31_v5, %v26_v4 }
  0x9b   :  { %34 = vst.msk [vmem:[#allocation2] sm:$0xff] %vm24_vm0, %v32_v6 }
  0xa2   :  { %v35_v7 = vld [vmem:[#allocation2] sm:$0xff] }
  0xa3   :  { %v36_v8 = vmul.f32 0.00390625, %v35_v7 }
  0xa5   :  { %37 = vst.msk [vmem:[%s86_s1] sm:$0xff] %vm24_vm0, %v36_v8 }
  0xa6   :  { %42 = vsyncpa [#allocation4], 1 }

</bundles_post_ra>
